<compile_context>
chip_gen: v7x
topology: tpu7x:2x2x1
jax: 0.10.0
libtpu: 0.0.40
codegen_flags: <defaults>
</compile_context>

<pallas_src>
import math
import jax
import jax.numpy as jnp
from jax.experimental import pallas as pl
from jax.experimental.pallas import tpu as pltpu


# ------------------------------ small helpers ------------------------------ #
def _round_up(x, m):
    return (x + m - 1) // m * m


def _largest_divisor_tile(total_p, max_tile, unit=128):
    """Largest multiple of `unit` that divides total_p and is <= max_tile."""
    n = total_p // unit
    cap = max(1, min(n, max_tile // unit))
    for d in range(cap, 0, -1):
        if n % d == 0:
            return d * unit
    return unit


def _vmem_capacity_bytes():
    """Physical VMEM of the current TPU generation (fallback: 64 MiB, the
    smallest per-core VMEM across v5e/v6e/v7x)."""
    cap = 0
    try:
        cap = int(pltpu.get_tpu_info().vmem_capacity_bytes)
    except Exception:
        cap = 0
    return cap if cap >= (32 << 20) else (64 << 20)


# ----------------------------- Pallas kernels ------------------------------ #
def _ffn_ws_kernel(x_ref, w1_ref, b1_ref, w2_ref, b2_ref, o_ref):
    """Weight-stationary path: full W1/W2 resident in VMEM, 1-D token grid."""
    x = x_ref[...].astype(jnp.bfloat16)                   # in-kernel cast (VPU)
    h = jnp.dot(x, w1_ref[...], preferred_element_type=jnp.float32)
    h = jnp.maximum(h + b1_ref[...], 0.0)                 # bias + ReLU in f32
    # TODO(synk): dropout is identity here (inference / eval semantics);
    # training-mode dropout would use pltpu.prng_seed + pltpu.stateful_bernoulli.
    out = jnp.dot(h.astype(jnp.bfloat16), w2_ref[...],
                  preferred_element_type=jnp.float32)
    o_ref[...] = (out + b2_ref[...]).astype(o_ref.dtype)


def _ffn_red_f32_kernel(x_ref, w1_ref, b1_ref, w2_ref, b2_ref, o_ref):
    """Reduction path, f32 output: accumulate directly into the VMEM-resident
    output block (no scratch accumulator)."""
    k = pl.program_id(1)

    @pl.when(k == 0)
    def _init():
        # Seed the output tile with b2 so no finalize pass is needed.
        o_ref[...] = jnp.broadcast_to(b2_ref[...], o_ref.shape)

    x = x_ref[...].astype(jnp.bfloat16)
    h = jnp.dot(x, w1_ref[...], preferred_element_type=jnp.float32)
    h = jnp.maximum(h + b1_ref[...], 0.0)
    o_ref[...] += jnp.dot(h.astype(jnp.bfloat16), w2_ref[...],
                          preferred_element_type=jnp.float32)


def _ffn_red_acc_kernel(x_ref, w1_ref, b1_ref, w2_ref, b2_ref, o_ref, acc_ref):
    """Reduction path, non-f32 output: f32 VMEM scratch accumulator."""
    k = pl.program_id(1)

    @pl.when(k == 0)
    def _init():
        acc_ref[...] = jnp.broadcast_to(b2_ref[...], acc_ref.shape)

    x = x_ref[...].astype(jnp.bfloat16)
    h = jnp.dot(x, w1_ref[...], preferred_element_type=jnp.float32)
    h = jnp.maximum(h + b1_ref[...], 0.0)
    acc_ref[...] += jnp.dot(h.astype(jnp.bfloat16), w2_ref[...],
                            preferred_element_type=jnp.float32)

    @pl.when(k == pl.num_programs(1) - 1)
    def _finalize():
        o_ref[...] = acc_ref[...].astype(o_ref.dtype)


# ------------------------- parameter preparation --------------------------- #
def prepare_ffn_params(w1, b1, w2, b2, compute_dtype=jnp.bfloat16):
    """Pad (128-aligned lane dims) and cast weights ONCE, outside the per-call
    wrapper, so repeated calls don't pay an extra HBM pass over the weights."""
    d_embed, d_ff = w1.shape
    d_embed_p = _round_up(d_embed, 128)
    d_ff_p = _round_up(d_ff, 128)
    # NOTE: d_embed/d_ff are commonly multiples of 256 already (v6e/v7x MXU is
    # 256x256); we keep 128 alignment here since extra zero-padding would add
    # real HBM weight traffic for mem-bound configs.

    def pad2(a, r, c):
        if a.shape == (r, c):
            return a
        return jnp.pad(a, ((0, r - a.shape[0]), (0, c - a.shape[1])))

    w1_p = pad2(w1, d_embed_p, d_ff_p).astype(compute_dtype)
    w2_p = pad2(w2, d_ff_p, d_embed_p).astype(compute_dtype)
    b1_p = jnp.pad(b1, (0, d_ff_p - d_ff)).reshape(1, d_ff_p).astype(jnp.float32)
    b2_p = jnp.pad(b2, (0, d_embed_p - d_embed)).reshape(1, d_embed_p).astype(jnp.float32)
    return dict(w1=w1_p, b1=b1_p, w2=w2_p, b2=b2_p,
                d_embed=d_embed, d_ff=d_ff, d_embed_p=d_embed_p, d_ff_p=d_ff_p)


# ------------------------------ Python wrapper ----------------------------- #
def position_wise_ffn(x, params, *, token_tile=1024, ff_tile=512,
                      out_dtype=None, force_reduction=False):
    """x: (B, S, d_embed), params from prepare_ffn_params.
    Returns (B, S, d_embed) in out_dtype (default: x.dtype)."""
    B, S, d_embed = x.shape
    assert d_embed == params["d_embed"], "d_embed mismatch with prepared params"
    d_embed_p, d_ff_p = params["d_embed_p"], params["d_ff_p"]
    w1_p, b1_p, w2_p, b2_p = params["w1"], params["b1"], params["w2"], params["b2"]

    out_dtype = jnp.dtype(x.dtype if out_dtype is None else out_dtype)
    xb = jnp.dtype(x.dtype).itemsize
    ob = out_dtype.itemsize
    weight_bytes = (w1_p.size + w2_p.size) * w1_p.dtype.itemsize

    T = B * S

    # --- token tiling (multiples of 16 for bf16 sublane packing) ---
    tm = max(16, min(_round_up(token_tile, 16), _round_up(T, 16)))
    T_p = _round_up(T, tm)
    # keep >=2 token tiles when possible so the "parallel" axis can feed both
    # v7x TensorCores (and pipelines better everywhere).
    while T_p // tm < 2 and tm > 16:
        tm = _round_up(max(16, tm // 2), 16)
        T_p = _round_up(T, tm)

    cap = _vmem_capacity_bytes()
    budget = int(cap * 0.70)          # leave headroom for compiler scratch

    # --- path selection: weight-stationary if the full weights fit VMEM ---
    def ws_bytes_for(tm_):
        return (2 * tm_ * d_embed_p * xb        # x tile (double-buffered)
                + 2 * weight_bytes              # W1 + W2 blocks (budget x2)
                + 2 * tm_ * d_embed_p * ob      # output tile
                + tm_ * d_ff_p * 4              # hidden activation (f32)
                + 4 * (d_ff_p + d_embed_p) * 4)  # biases

    ws_tm = tm
    while (not force_reduction) and ws_bytes_for(ws_tm) > budget and ws_tm > 256:
        ws_tm = _round_up(max(256, ws_tm // 2), 16)
    use_ws = (not force_reduction) and ws_bytes_for(ws_tm) <= budget

    if use_ws:
        tm = ws_tm
        T_p = _round_up(T, tm)
        footprint = ws_bytes_for(tm)
        weight_streams = 1
        grid = (T_p // tm,)
        grid_spec = pltpu.PrefetchScalarGridSpec(
            num_scalar_prefetch=0,
            grid=grid,
            in_specs=[
                pl.BlockSpec((tm, d_embed_p), lambda i: (i, 0)),        # x tile
                pl.BlockSpec((d_embed_p, d_ff_p), lambda i: (0, 0)),    # W1 (stationary)
                pl.BlockSpec((1, d_ff_p), lambda i: (0, 0)),            # b1
                pl.BlockSpec((d_ff_p, d_embed_p), lambda i: (0, 0)),    # W2 (stationary)
                pl.BlockSpec((1, d_embed_p), lambda i: (0, 0)),         # b2
            ],
            out_specs=pl.BlockSpec((tm, d_embed_p), lambda i: (i, 0)),
            scratch_shapes=[],
        )
        kernel = _ffn_ws_kernel
        dim_sem = ("parallel",)
    else:
        # --- 2-D (token, d_ff-reduction) grid; tk divides d_ff_p exactly ---
        tk = _largest_divisor_tile(d_ff_p, max(128, ff_tile))

        def red_bytes_for(tm_, tk_):
            b = (2 * tm_ * d_embed_p * xb          # x tile
                 + 4 * tk_ * d_embed_p * 2         # W1 + W2 chunks (bf16, x2 bufs)
                 + 2 * tm_ * d_embed_p * ob        # output tile
                 + tm_ * tk_ * 4                   # hidden chunk (f32)
                 + 4 * (tk_ + d_embed_p) * 4)      # biases
            if out_dtype != jnp.dtype(jnp.float32):
                b += tm_ * d_embed_p * 4           # f32 scratch accumulator
            return b

        while red_bytes_for(tm, tk) > budget and tk > 128:
            tk = _largest_divisor_tile(d_ff_p, max(128, tk // 2))
        while red_bytes_for(tm, tk) > budget and tm > 16:
            tm = _round_up(max(16, tm // 2), 16)
        T_p = _round_up(T, tm)

        footprint = red_bytes_for(tm, tk)
        weight_streams = T_p // tm
        grid = (T_p // tm, d_ff_p // tk)
        if out_dtype == jnp.dtype(jnp.float32):
            kernel = _ffn_red_f32_kernel
            scratch = []
        else:
            kernel = _ffn_red_acc_kernel
            scratch = [pltpu.VMEM((tm, d_embed_p), jnp.float32)]
        grid_spec = pltpu.PrefetchScalarGridSpec(
            num_scalar_prefetch=0,
            grid=grid,
            in_specs=[
                pl.BlockSpec((tm, d_embed_p), lambda i, k: (i, 0)),     # x tile
                pl.BlockSpec((d_embed_p, tk), lambda i, k: (0, k)),     # W1 k-chunk
                pl.BlockSpec((1, tk), lambda i, k: (0, k)),             # b1 k-chunk
                pl.BlockSpec((tk, d_embed_p), lambda i, k: (k, 0)),     # W2 k-chunk
                pl.BlockSpec((1, d_embed_p), lambda i, k: (0, 0)),      # b2
            ],
            out_specs=pl.BlockSpec((tm, d_embed_p), lambda i, k: (i, 0)),
            scratch_shapes=scratch,
        )
        dim_sem = ("parallel", "arbitrary")

    # --- prepare x: pad only if needed, NO dtype cast in the wrapper ---
    x2 = x.reshape(T, d_embed)
    if T_p != T or d_embed_p != d_embed:
        x2 = jnp.pad(x2, ((0, T_p - T), (0, d_embed_p - d_embed)))

    # --- per-generation VMEM limit derived from actual tile bytes ---
    vmem_limit = int(min(cap * 0.85, max(footprint + (16 << 20), 32 << 20)))

    # --- truthful cost estimate (weights re-streamed weight_streams times) ---
    flops = 4 * T_p * d_embed_p * d_ff_p
    bytes_accessed = (T_p * d_embed_p * (xb + ob)
                      + weight_streams * weight_bytes
                      + (d_ff_p + d_embed_p) * 4)
    cost = pl.CostEstimate(flops=flops, transcendentals=0,
                           bytes_accessed=bytes_accessed)

    out2 = pl.pallas_call(
        kernel,
        out_shape=jax.ShapeDtypeStruct((T_p, d_embed_p), out_dtype),
        grid_spec=grid_spec,
        compiler_params=pltpu.CompilerParams(
            dimension_semantics=dim_sem,
            vmem_limit_bytes=vmem_limit,
        ),
        cost_estimate=cost,
    )(x2, w1_p, b1_p, w2_p, b2_p)

    return out2[:T, :d_embed].reshape(B, S, d_embed)


# --------------------------- deterministic params --------------------------- #
def init_linear_params(key, in_features, out_features):
    """Mimic torch.nn.Linear default init: U(-1/sqrt(in), 1/sqrt(in)).
    Weight stored as (in_features, out_features) for x @ W."""
    kw, kb = jax.random.split(key)
    bound = 1.0 / math.sqrt(in_features)
    w = jax.random.uniform(kw, (in_features, out_features),
                           minval=-bound, maxval=bound, dtype=jnp.float32)
    b = jax.random.uniform(kb, (out_features,),
                           minval=-bound, maxval=bound, dtype=jnp.float32)
    return w, b


if __name__ == "__main__":
    key = jax.random.PRNGKey(0)

    def run_case(B, S, d_embed, d_ff, *, x_dtype=jnp.float32,
                 force_reduction=False, token_tile=1024, ff_tile=512, tol=5e-2):
        kcase = jax.random.fold_in(key, B * 1000 + S * 100 + d_embed + d_ff)
        kx, k1, k2 = jax.random.split(kcase, 3)
        x = jax.random.normal(kx, (B, S, d_embed), dtype=jnp.float32)
        w1, b1 = init_linear_params(k1, d_embed, d_ff)
        w2, b2 = init_linear_params(k2, d_ff, d_embed)

        params = prepare_ffn_params(w1, b1, w2, b2)   # one-time weight prep
        out = position_wise_ffn(x.astype(x_dtype), params,
                                token_tile=token_tile, ff_tile=ff_tile,
                                force_reduction=force_reduction)
        out = jax.block_until_ready(out)

        # Pure-JAX f32 reference (dropout = identity in eval mode).
        ref = jnp.maximum(x.reshape(-1, d_embed) @ w1 + b1, 0.0) @ w2 + b2
        ref = ref.reshape(B, S, d_embed)
        assert out.shape == ref.shape
        assert out.dtype == jnp.dtype(x_dtype)
        assert jnp.allclose(out.astype(jnp.float32), ref, atol=tol, rtol=tol), \
            "mismatch vs reference"

    # Small config (stands in for ModelConfig): d_embed=32, d_ff=64
    # 1) weight-stationary fast path (weights easily fit VMEM)
    run_case(2, 8, 32, 64)
    # 2) forced 2-D reduction path, f32 output (accumulate into o_ref),
    #    multiple token tiles and multiple d_ff chunks
    run_case(2, 24, 32, 384, force_reduction=True, token_tile=16, ff_tile=128)
    # 3) forced reduction path with bf16 in/out (f32 scratch accumulator)
    run_case(2, 24, 32, 384, x_dtype=jnp.bfloat16, force_reduction=True,
             token_tile=16, ff_tile=128, tol=1e-1)

    print("KERNEL_OK")
</pallas_src>

<mosaic_0001>
module attributes {stable_mosaic.version = 11 : i64} {
  func.func @_ffn_ws_kernel(%arg0: i32, %arg1: memref<16x128xf32, #tpu.memory_space<vmem>>, %arg2: memref<128x128xbf16, #tpu.memory_space<vmem>>, %arg3: memref<1x128xf32, #tpu.memory_space<vmem>>, %arg4: memref<128x128xbf16, #tpu.memory_space<vmem>>, %arg5: memref<1x128xf32, #tpu.memory_space<vmem>>, %arg6: memref<16x128xf32, #tpu.memory_space<vmem>>) attributes {dimension_semantics = [#tpu.dimension_semantics<parallel>], iteration_bounds = array<i64: 1>, scalar_prefetch = 0 : i64, scratch_operands = 0 : i64, tpu.core_type = #tpu.core_type<tc>, window_params = [{transform_indices = @transform_0, window_bounds = array<i64: 16, 128>}, {pipeline_mode = #tpu.pipeline_mode<synchronous>, transform_indices = @transform_1, window_bounds = array<i64: 128, 128>}, {pipeline_mode = #tpu.pipeline_mode<synchronous>, transform_indices = @transform_2, window_bounds = array<i64: 1, 128>}, {pipeline_mode = #tpu.pipeline_mode<synchronous>, transform_indices = @transform_3, window_bounds = array<i64: 128, 128>}, {pipeline_mode = #tpu.pipeline_mode<synchronous>, transform_indices = @transform_4, window_bounds = array<i64: 1, 128>}, {transform_indices = @transform_5, window_bounds = array<i64: 16, 128>}]} {
    %c0 = arith.constant 0 : index
    %c0_0 = arith.constant 0 : index
    %0 = vector.load %arg1[%c0, %c0_0] : memref<16x128xf32, #tpu.memory_space<vmem>>, vector<16x128xf32>
    %1 = arith.truncf %0 : vector<16x128xf32> to vector<16x128xbf16>
    %c0_1 = arith.constant 0 : index
    %c0_2 = arith.constant 0 : index
    %2 = vector.load %arg2[%c0_1, %c0_2] : memref<128x128xbf16, #tpu.memory_space<vmem>>, vector<128x128xbf16>
    %cst = arith.constant dense<0.000000e+00> : vector<16x128xf32>
    %3 = tpu.matmul %1, %2, %cst {dimension_numbers = #tpu.dot_dimension_numbers<[1], [0], [0], [1], [0, 0, 1, 1], [], []>} : vector<16x128xbf16>, vector<128x128xbf16>, vector<16x128xf32> -> vector<16x128xf32>
    %c0_3 = arith.constant 0 : index
    %c0_4 = arith.constant 0 : index
    %4 = vector.load %arg3[%c0_3, %c0_4] : memref<1x128xf32, #tpu.memory_space<vmem>>, vector<1x128xf32>
    %5 = vector.broadcast %4 : vector<1x128xf32> to vector<16x128xf32>
    %6 = arith.addf %3, %5 : vector<16x128xf32>
    %cst_5 = arith.constant 0.000000e+00 : f32
    %7 = vector.broadcast %cst_5 : f32 to vector<16x128xf32>
    %8 = arith.maximumf %6, %7 : vector<16x128xf32>
    %9 = arith.truncf %8 : vector<16x128xf32> to vector<16x128xbf16>
    %c0_6 = arith.constant 0 : index
    %c0_7 = arith.constant 0 : index
    %10 = vector.load %arg4[%c0_6, %c0_7] : memref<128x128xbf16, #tpu.memory_space<vmem>>, vector<128x128xbf16>
    %cst_8 = arith.constant dense<0.000000e+00> : vector<16x128xf32>
    %11 = tpu.matmul %9, %10, %cst_8 {dimension_numbers = #tpu.dot_dimension_numbers<[1], [0], [0], [1], [0, 0, 1, 1], [], []>} : vector<16x128xbf16>, vector<128x128xbf16>, vector<16x128xf32> -> vector<16x128xf32>
    %c0_9 = arith.constant 0 : index
    %c0_10 = arith.constant 0 : index
    %12 = vector.load %arg5[%c0_9, %c0_10] : memref<1x128xf32, #tpu.memory_space<vmem>>, vector<1x128xf32>
    %13 = vector.broadcast %12 : vector<1x128xf32> to vector<16x128xf32>
    %14 = arith.addf %11, %13 : vector<16x128xf32>
    %c0_11 = arith.constant 0 : index
    %c0_12 = arith.constant 0 : index
    %15 = vector.load %arg6[%c0_11, %c0_12] : memref<16x128xf32, #tpu.memory_space<vmem>>, vector<16x128xf32>
    tpu.vector_store %arg6[%c0_11, %c0_12], %14 {strides = array<i32>} : memref<16x128xf32, #tpu.memory_space<vmem>>, vector<16x128xf32>,
    return
  }
  func.func @transform_0(%arg0: i32) -> (i32, i32) {
    %c0_i32 = arith.constant 0 : i32
    %c0_i32_0 = arith.constant 0 : i32
    return %arg0, %c0_i32 : i32, i32
  }
  func.func @transform_1(%arg0: i32) -> (i32, i32) {
    %c0_i32 = arith.constant 0 : i32
    %c0_i32_0 = arith.constant 0 : i32
    %c0_i32_1 = arith.constant 0 : i32
    return %c0_i32, %c0_i32_0 : i32, i32
  }
  func.func @transform_2(%arg0: i32) -> (i32, i32) {
    %c0_i32 = arith.constant 0 : i32
    %c0_i32_0 = arith.constant 0 : i32
    %c0_i32_1 = arith.constant 0 : i32
    return %c0_i32, %c0_i32_0 : i32, i32
  }
  func.func @transform_3(%arg0: i32) -> (i32, i32) {
    %c0_i32 = arith.constant 0 : i32
    %c0_i32_0 = arith.constant 0 : i32
    %c0_i32_1 = arith.constant 0 : i32
    return %c0_i32, %c0_i32_0 : i32, i32
  }
  func.func @transform_4(%arg0: i32) -> (i32, i32) {
    %c0_i32 = arith.constant 0 : i32
    %c0_i32_0 = arith.constant 0 : i32
    %c0_i32_1 = arith.constant 0 : i32
    return %c0_i32, %c0_i32_0 : i32, i32
  }
  func.func @transform_5(%arg0: i32) -> (i32, i32) {
    %c0_i32 = arith.constant 0 : i32
    %c0_i32_0 = arith.constant 0 : i32
    return %arg0, %c0_i32 : i32, i32
  }
}

</mosaic_0001>

<bundles_post_ra>
// kernel: tpu_custom_call.1
= control target key start
LH: loop header
LB: loop body
LE: loop exit
PB: predicated region body
PF: predicated region fallthrough
CT: control target
= control target key end

     0   :  { %10 = vsyncpa [#allocation3], 0  ;;  %s615_s0 = inlined_call_operand.hbm [shape: f32[16,128], index: 0, kind: input, shape index: {}]   ;;  %s616_s1 = inlined_call_operand.hbm [shape: bf16[128,128], index: 1, kind: input, shape index: {}]   ;;  %s617_s2 = inlined_call_operand.vmem [shape: f32[1,128], index: 2, kind: input, shape index: {}]   ;;  %s618_s3 = inlined_call_operand.hbm [shape: bf16[128,128], index: 3, kind: input, shape index: {}]   ;;  %s619_s4 = inlined_call_operand.vmem [shape: f32[1,128], index: 4, kind: input, shape index: {}]   ;;  %s620_s5 = inlined_call_operand.hbm [shape: f32[16,128], index: 5, kind: output, shape index: {}]  }
   0x1   :  { %11 = vsyncpa [#allocation6], 0 }
   0x2   :  { %12 = vsyncpa [#allocation4], 0  ;;  %s509_s18 = smov [#allocation5]   ;;  %s415_s22 = scalar_lea.hbm %s616_s1, 1024 }
   0x3   :  { %s30_s19 = sshll.u32 %s509_s18, 4  ;;  %p416_p0 = scmp.ne.s32.totalorder %s616_s1, %s415_s22  ;;  %s31_s19 = int_to_ptr.vmem [resolvable:$true] %s30_s19 }
   0x4   :  { %p419_p1 = scmp.lt.u32.totalorder %s415_s22, %s616_s1 }
   0x6   :  { %p421_p2 = pnand %p419_p1, %p416_p0 }
   0x8   :  { %424 = shalt.err (!%p421_p2)
}
   0x9   :  { %s425_s27 = scalar_lea.vmem %s31_s19, 1024  ;;  %p430_p4 = scmp.lt.s32.totalorder %s31_s19, %s31_s19 }
   0xa   :  { %p426_p3 = scmp.ne.s32.totalorder %s31_s19, %s425_s27  ;;  %p431_p5 = scmp.lt.s32.totalorder %s425_s27, %s425_s27 }
   0xc   :  { %p432_p6 = por %p431_p5, %p430_p4 }
   0xe   :  { %p433_p7 = pnand %p432_p6, %p426_p3 }
  0x10   :  { %436 = shalt.err (!%p433_p7)
}
  0x11   :  { %s510_s28 = smov 64   ;;  %s511_s29 = smov 4  }
  0x12   :  { %36 = dma.hbm_to_vmem [thread:$0]  %s616_s1, 1024, %s31_s19, [#allocation6], %s510_s28, %s510_s28, %s511_s29  }
  0x13   :  { %s512_s7 = smov [#allocation2]   ;;  %s437_s11 = scalar_lea.hbm %s615_s0, 256 }
  0x14   :  { %s18_s8 = sshll.u32 %s512_s7, 4  ;;  %p438_p8 = scmp.ne.s32.totalorder %s615_s0, %s437_s11  ;;  %s19_s8 = int_to_ptr.vmem [resolvable:$true] %s18_s8 }
  0x15   :  { %p441_p9 = scmp.lt.u32.totalorder %s437_s11, %s615_s0 }
  0x17   :  { %p443_p10 = pnand %p441_p9, %p438_p8 }
  0x19   :  { %446 = shalt.err (!%p443_p10)
}
  0x1a   :  { %s447_s16 = scalar_lea.vmem %s19_s8, 256  ;;  %p452_p12 = scmp.lt.s32.totalorder %s19_s8, %s19_s8 }
  0x1b   :  { %p448_p11 = scmp.ne.s32.totalorder %s19_s8, %s447_s16  ;;  %p453_p13 = scmp.lt.s32.totalorder %s447_s16, %s447_s16 }
  0x1d   :  { %p454_p0 = por %p453_p13, %p452_p12 }
  0x1f   :  { %p455_p1 = pnand %p454_p0, %p448_p11 }
  0x21   :  { %458 = shalt.err (!%p455_p1)
}
  0x22   :  { %s513_s1 = smov 128   ;;  %s514_s17 = smov 8  }
  0x23   :  { %24 = dma.hbm_to_vmem [thread:$0]  %s615_s0, 256, %s19_s8, [#allocation3], %s513_s1, %s513_s1, %s514_s17  }
  0x24   :  { %s515_s20 = smov [#allocation7]   ;;  %s459_s24 = scalar_lea.hbm %s618_s3, 1024 }
  0x25   :  { %s44_s21 = sshll.u32 %s515_s20, 4  ;;  %p460_p2 = scmp.ne.s32.totalorder %s618_s3, %s459_s24  ;;  %s45_s21 = int_to_ptr.vmem [resolvable:$true] %s44_s21 }
  0x26   :  { %p463_p3 = scmp.lt.u32.totalorder %s459_s24, %s618_s3 }
  0x28   :  { %p465_p4 = pnand %p463_p3, %p460_p2 }
  0x2a   :  { %468 = shalt.err (!%p465_p4)
}
  0x2b   :  { %s469_s6 = scalar_lea.vmem %s45_s21, 1024  ;;  %p474_p6 = scmp.lt.s32.totalorder %s45_s21, %s45_s21 }
  0x2c   :  { %p470_p5 = scmp.ne.s32.totalorder %s45_s21, %s469_s6  ;;  %p475_p7 = scmp.lt.s32.totalorder %s469_s6, %s469_s6 }
  0x2e   :  { %p476_p8 = por %p475_p7, %p474_p6 }
  0x30   :  { %p477_p9 = pnand %p476_p8, %p470_p5 }
  0x32   :  { %480 = shalt.err (!%p477_p9)
}
  0x33   :  { %50 = dma.hbm_to_vmem [thread:$0]  %s618_s3, 1024, %s45_s21, [#allocation6], %s510_s28, %s510_s28, %s511_s29  }
  0x34   :  { %503 = dma.done.wait [#allocation3], 256  }
  0x35   :  { %504 = vsyncadd [#allocation3], 4294967040 }
  0x36   :  { %505 = dma.done.wait [#allocation6], 2048  }
  0x37   :  { %506 = vsyncadd [#allocation6], 4294965248  ;;  %v516_v0 = vmov 0.0   ;;  %vm517_vm0 = vmmov 0   ;;  %v399_v1 = vld [vmem:[#allocation5] sm:$0xff]   ;;  %v400_v2 = vld [vmem:[#allocation5 + $0x8] sm:$0xff]  }
  0x38   :  { %349 = vmatprep.subr.bf16.mxu0 %v516_v0  ;;  %365 = vmatprep.mubr.msk.bf16.mxu0 %vm517_vm0, %v516_v0  ;;  %v401_v3 = vld [vmem:[#allocation5 + $0x10] sm:$0xff]   ;;  %v407_v4 = vld [vmem:[#allocation7] sm:$0xff]   ;;  %v402_v5 = vld [vmem:[#allocation5 + $0x18] sm:$0xff]   ;;  %s518_s9 = smov [#allocation8]  }
  0x39   :  { %369 = vmatprep.subr.bf16.mxu1 %v516_v0  ;;  %385 = vmatprep.mubr.msk.bf16.mxu1 %vm517_vm0, %v516_v0  ;;  %v408_v6 = vld [vmem:[#allocation7 + $0x8] sm:$0xff]   ;;  %v403_v7 = vld [vmem:[#allocation5 + $0x20] sm:$0xff]   ;;  %v409_v8 = vld [vmem:[#allocation7 + $0x10] sm:$0xff]   ;;  %s300_s10 = sshll.u32 %s518_s9, 4  ;;  %s301_s10 = int_to_ptr.vmem [resolvable:$true] %s300_s10 }
  0x3a   :  { %350 = vmatpush3.bf16.msra.mxu0 %v399_v1  ;;  %370 = vmatpush3.bf16.msra.mxu1 %v407_v4  ;;  %v404_v9 = vld [vmem:[#allocation5 + $0x28] sm:$0xff]   ;;  %v410_v10 = vld [vmem:[#allocation7 + $0x18] sm:$0xff]   ;;  %v405_v11 = vld [vmem:[#allocation5 + $0x30] sm:$0xff]   ;;  %p486_p11 = scmp.lt.s32.totalorder %s301_s10, %s301_s10 }
  0x3b   :  { %351 = vmatprep.subr.bf16.mxu0 %v516_v0  ;;  %371 = vmatprep.subr.bf16.mxu1 %v516_v0  ;;  %v411_v12 = vld [vmem:[#allocation7 + $0x20] sm:$0xff]   ;;  %v406_v13 = vld [vmem:[#allocation5 + $0x38] sm:$0xff]   ;;  %v63_v14 = vld [vmem:[#allocation2] sm:$0xff] }
  0x3c   :  { %v64_v15 = vld [vmem:[#allocation2 + $0x8] sm:$0xff]  ;;  %v412_v16 = vld [vmem:[#allocation7 + $0x28] sm:$0xff]   ;;  %v413_v18 = vld [vmem:[#allocation7 + $0x30] sm:$0xff]  }
  0x3d   :  { %v65_v17 = vpack.c.bf16 %v64_v15, %v63_v14  ;;  %v414_v19 = vld [vmem:[#allocation7 + $0x38] sm:$0xff]   ;;  %v313_v20 = vld [vmem:[%s617_s2] ss:$0 sm:$0xff]  ;;  %s481_s2 = scalar_lea.vmem %s301_s10, 256 }
  0x3e   :  { %352 = vmatpush3.bf16.msra.mxu0 %v400_v2  ;;  %372 = vmatpush3.bf16.msra.mxu1 %v408_v6  ;;  %v322_v30 = vld [vmem:[%s619_s4] ss:$0 sm:$0xff]  ;;  %p482_p10 = scmp.ne.s32.totalorder %s301_s10, %s481_s2  ;;  %p487_p12 = scmp.lt.s32.totalorder %s481_s2, %s481_s2 }
  0x3f   :  { %353 = vmatprep.subr.bf16.mxu0 %v516_v0  ;;  %373 = vmatprep.subr.bf16.mxu1 %v516_v0 }
  0x40   :  { %p488_p13 = por %p487_p12, %p486_p11 }
  0x42   :  { %354 = vmatpush3.bf16.msra.mxu0 %v401_v3  ;;  %374 = vmatpush3.bf16.msra.mxu1 %v409_v8  ;;  %p489_p0 = pnand %p488_p13, %p482_p10 }
  0x43   :  { %355 = vmatprep.subr.bf16.mxu0 %v516_v0  ;;  %375 = vmatprep.subr.bf16.mxu1 %v516_v0 }
  0x46   :  { %356 = vmatpush3.bf16.msra.mxu0 %v402_v5  ;;  %376 = vmatpush3.bf16.msra.mxu1 %v410_v10 }
  0x47   :  { %357 = vmatprep.subr.bf16.mxu0 %v516_v0  ;;  %377 = vmatprep.subr.bf16.mxu1 %v516_v0 }
  0x4a   :  { %358 = vmatpush3.bf16.msra.mxu0 %v403_v7  ;;  %378 = vmatpush3.bf16.msra.mxu1 %v411_v12 }
  0x4b   :  { %359 = vmatprep.subr.bf16.mxu0 %v516_v0  ;;  %379 = vmatprep.subr.bf16.mxu1 %v516_v0 }
  0x4e   :  { %360 = vmatpush3.bf16.msra.mxu0 %v404_v9  ;;  %380 = vmatpush3.bf16.msra.mxu1 %v412_v16 }
  0x4f   :  { %361 = vmatprep.subr.bf16.mxu0 %v516_v0  ;;  %381 = vmatprep.subr.bf16.mxu1 %v516_v0 }
  0x52   :  { %362 = vmatpush3.bf16.msra.mxu0 %v405_v11  ;;  %382 = vmatpush3.bf16.msra.mxu1 %v413_v18 }
  0x53   :  { %363 = vmatprep.subr.bf16.mxu0 %v516_v0  ;;  %383 = vmatprep.subr.bf16.mxu1 %v516_v0 }
  0x56   :  { %364 = vmatpush3.bf16.msra.mxu0 %v406_v13  ;;  %384 = vmatpush3.bf16.msra.mxu1 %v414_v19 }
  0x59   :  { %366 = vmatmul.mubr.bf16.vlgmr.msra.gmra.mrb[0].mxu0 %v65_v17 }
 0x12c   :  { %v171_v21 = vpop.f32.mrb[0].mxu0 }
 0x12d   :  { %v172_v22 = vadd.f32 %v313_v20, %v171_v21  ;;  %v367_v23 = vpop.f32.mrb[1].mxu0 }
 0x12e   :  { %v174_v24 = vpop.f32.mrb[2].mxu0 }
 0x12f   :  { %v175_v25 = vadd.f32 %v313_v20, %v174_v24  ;;  %v368_v26 = vpop.f32.mrb[3].mxu0  ;;  %v178_v27 = vmax.f32 %v172_v22, 0.0 }
 0x131   :  { %v179_v28 = vmax.f32 %v175_v25, 0.0 }
 0x133   :  { %v180_v29 = vpack.c.bf16 %v179_v28, %v178_v27 }
 0x135   :  { %386 = vmatmul.mubr.bf16.vlgmr.msra.gmra.mrb[0].mxu1 %v180_v29 }
 0x208   :  { %v286_v31 = vpop.f32.mrb[0].mxu1 }
 0x209   :  { %v287_v32 = vadd.f32 %v322_v30, %v286_v31  ;;  %v387_v33 = vpop.f32.mrb[1].mxu1 }
 0x20a   :  { %v289_v34 = vpop.f32.mrb[2].mxu1 }
 0x20b   :  { %293 = vst [vmem:[#allocation8] sm:$0xff] %v287_v32  ;;  %v290_v35 = vadd.f32 %v322_v30, %v289_v34  ;;  %v388_v36 = vpop.f32.mrb[3].mxu1 }
 0x20d   :  { %294 = vst [vmem:[#allocation8 + $0x8] sm:$0xff] %v290_v35 }
 0x20e   :  { %492 = shalt.err (!%p489_p0)
}
 0x20f   :  { %s493_s12 = scalar_lea.hbm %s620_s5, 256 }
 0x210   :  { %p494_p1 = scmp.ne.s32.totalorder %s620_s5, %s493_s12  ;;  %p497_p2 = scmp.lt.u32.totalorder %s493_s12, %s620_s5 }
 0x212   :  { %p499_p3 = pnand %p497_p2, %p494_p1 }
 0x214   :  { %502 = shalt.err (!%p499_p3)
}
 0x215   :  { %306 = dma.vmem_to_hbm [thread:$0]  %s301_s10, 256, %s620_s5, [#allocation4], %s513_s1, %s513_s1, %s514_s17  }
 0x216   :  { %507 = dma.done.wait [#allocation4], 256  }
 0x217   :  { %508 = vsyncadd [#allocation4], 4294967040 }
 0x218   :  { %310 = vsyncpa [#allocation3], 1 }
 0x219   :  { %311 = vsyncpa [#allocation6], 1 }
 0x21a   :  { %312 = vsyncpa [#allocation4], 1 }

</bundles_post_ra>
